<compile_context>
chip_gen: v7x
topology: tpu7x:2x2x1
jax: 0.10.0
libtpu: 0.0.40
codegen_flags: <defaults>
</compile_context>

<pallas_src>
import math
import functools

import jax
import jax.numpy as jnp
from jax.experimental import pallas as pl
from jax.experimental.pallas import tpu as pltpu


# ----------------------------------------------------------------------------
# Kernels
# ----------------------------------------------------------------------------
def _fused_mlp_kernel(x_ref, w_init_ref, w_hid_ref, w_fin_ref, o_ref, *, num_hidden):
    """Entire SimpleNet forward on one batch block; weights are VMEM-resident.

    x_ref:      (block_b, initial)            f32 activations
    w_init_ref: (initial, width)              weight dtype (f32 or bf16)
    w_hid_ref:  (num_hidden, width, width)    hidden weights, pre-scaled by sqrt(2)
    w_fin_ref:  (1, width)                    final weight row, pre-scaled by sqrt(2)
    o_ref:      (block_b, 1)
    """
    wdt = w_init_ref.dtype
    # Initial layer + relu (sqrt(2) scale was folded into the NEXT layer's weights).
    h = jnp.maximum(
        jnp.dot(x_ref[...].astype(wdt), w_init_ref[...],
                preferred_element_type=jnp.float32),
        0.0,
    )
    # Hidden layers: static unroll (depth known at trace time).
    for i in range(num_hidden):
        h = jnp.maximum(
            jnp.dot(h.astype(wdt), w_hid_ref[i],
                    preferred_element_type=jnp.float32),
            0.0,
        )
    # Final layer (width -> 1): lane-wise multiply + lane reduction (VPU/XLU),
    # computed in f32 (no bf16 VALU on v5e).
    o_ref[...] = jnp.sum(
        h * w_fin_ref[...].astype(jnp.float32), axis=-1, keepdims=True
    ).astype(o_ref.dtype)


def _fused_mlp_kernel_nohidden(x_ref, w_init_ref, w_fin_ref, o_ref):
    """depth == 2 variant (no stacked hidden weights)."""
    wdt = w_init_ref.dtype
    h = jnp.maximum(
        jnp.dot(x_ref[...].astype(wdt), w_init_ref[...],
                preferred_element_type=jnp.float32),
        0.0,
    )
    o_ref[...] = jnp.sum(
        h * w_fin_ref[...].astype(jnp.float32), axis=-1, keepdims=True
    ).astype(o_ref.dtype)


# ----------------------------------------------------------------------------
# Host-side helpers
# ----------------------------------------------------------------------------
def _round_up(n, m):
    return ((n + m - 1) // m) * m


def init_simplenet_params(key, initial, depth, width, dtype=jnp.float32):
    """Deterministic parameter init (shapes match nn.Linear(..., bias=False)).

    Weights are stored as (in, out) — the transpose of PyTorch's (out, in).
    """
    keys = jax.random.split(key, depth)

    def mk(k, fan_in, fan_out):
        bound = 1.0 / math.sqrt(fan_in)
        return jax.random.uniform(
            k, (fan_in, fan_out), dtype=dtype, minval=-bound, maxval=bound
        )

    w_init = mk(keys[0], initial, width)                         # initial -> width
    w_hidden = [mk(keys[1 + i], width, width) for i in range(depth - 2)]
    w_final = mk(keys[-1], width, 1)                             # width -> 1
    return w_init, w_hidden, w_final


def prepare_simplenet_params(params, weight_dtype=jnp.float32):
    """ONE-TIME weight prep (do NOT call per forward).

    Folds each relu*sqrt(2) activation scale into the NEXT layer's weights
    (relu(h)*s @ W == relu(h) @ (s*W)), stacks hidden weights into a single
    (H, width, width) array, and lays the final weight out as a (1, width) row.
    Optionally stores weights in bf16 (recommended on v6e/v7x).
    """
    w_init, w_hidden, w_final = params
    s = math.sqrt(2.0)
    w_init_p = jnp.asarray(w_init).astype(weight_dtype)
    if len(w_hidden) > 0:
        w_hid_stack = jnp.stack([w * s for w in w_hidden]).astype(weight_dtype)
    else:
        w_hid_stack = None
    w_fin_row = (jnp.asarray(w_final) * s).T.astype(weight_dtype)   # (1, width)
    return w_init_p, w_hid_stack, w_fin_row


def simplenet_forward(x, prepared_params, block_b=None):
    """Fused SimpleNet forward: exactly ONE pallas_call per invocation.

    Grid is over batch blocks only; weight index_maps are constant, so weights
    are DMA'd once and reused across all batch blocks (and batch blocks can be
    sharded across TensorCores on v7x via dimension_semantics=("parallel",)).
    """
    w_init, w_hid_stack, w_fin_row = prepared_params
    B, initial = x.shape
    width = w_init.shape[1]
    num_hidden = 0 if w_hid_stack is None else w_hid_stack.shape[0]

    # Batch blocking: multiple of 8 sublanes, capped at 256 rows per block.
    if block_b is None:
        block_b = min(_round_up(B, 8), 256)
    B_pad = _round_up(B, block_b)
    if B_pad != B:
        x = jnp.pad(x, ((0, B_pad - B), (0, 0)))

    grid = (B_pad // block_b,)
    x_spec = pl.BlockSpec((block_b, initial), lambda i: (i, 0))
    w_init_spec = pl.BlockSpec((initial, width), lambda i: (0, 0))
    w_fin_spec = pl.BlockSpec((1, width), lambda i: (0, 0))
    out_spec = pl.BlockSpec((block_b, 1), lambda i: (i, 0))
    out_shape = jax.ShapeDtypeStruct((B_pad, 1), x.dtype)
    cparams = pltpu.CompilerParams(dimension_semantics=("parallel",))

    if num_hidden > 0:
        w_hid_spec = pl.BlockSpec(
            (num_hidden, width, width), lambda i: (0, 0, 0)
        )
        out = pl.pallas_call(
            functools.partial(_fused_mlp_kernel, num_hidden=num_hidden),
            out_shape=out_shape,
            grid=grid,
            in_specs=[x_spec, w_init_spec, w_hid_spec, w_fin_spec],
            out_specs=out_spec,
            compiler_params=cparams,
        )(x, w_init, w_hid_stack, w_fin_row)
    else:
        out = pl.pallas_call(
            _fused_mlp_kernel_nohidden,
            out_shape=out_shape,
            grid=grid,
            in_specs=[x_spec, w_init_spec, w_fin_spec],
            out_specs=out_spec,
            compiler_params=cparams,
        )(x, w_init, w_fin_row)

    return out[:B] if B_pad != B else out


# ----------------------------------------------------------------------------
# Test
# ----------------------------------------------------------------------------
if __name__ == "__main__":
    key = jax.random.PRNGKey(0)
    k_x, k_p, k_x2 = jax.random.split(key, 3)

    initial, depth, width = 32, 4, 128
    params = init_simplenet_params(k_p, initial, depth, width)
    w_init, w_hidden, w_final = params

    def ref_forward(xx):
        # Pure-JAX reference of the ORIGINAL module semantics (unscaled
        # weights, explicit relu * sqrt(2)).
        s = math.sqrt(2.0)
        h = jnp.maximum(xx @ w_init, 0.0) * s
        for w in w_hidden:
            h = jnp.maximum(h @ w, 0.0) * s
        return h @ w_final

    # --- Case 1: f32 weights, small batch (single grid step) -----------------
    batch = 8
    x = jax.random.normal(k_x, (batch, initial), dtype=jnp.float32)
    prepared_f32 = prepare_simplenet_params(params, weight_dtype=jnp.float32)
    out = jax.block_until_ready(simplenet_forward(x, prepared_f32))
    ref = ref_forward(x)
    assert out.shape == (batch, 1), out.shape
    assert jnp.allclose(out, ref, atol=1e-4, rtol=1e-4), "f32 mismatch vs reference"

    # --- Case 2: bf16 weights, large batch exercising grid + padding ---------
    batch2 = 500                      # pads to 512 -> grid of 2 batch blocks
    x2 = jax.random.normal(k_x2, (batch2, initial), dtype=jnp.float32)
    prepared_bf16 = prepare_simplenet_params(params, weight_dtype=jnp.bfloat16)
    out2 = jax.block_until_ready(simplenet_forward(x2, prepared_bf16))
    ref2 = ref_forward(x2)
    assert out2.shape == (batch2, 1), out2.shape
    # bf16 weight/activation storage -> looser tolerance vs f32 reference.
    assert jnp.allclose(out2, ref2, atol=5e-2, rtol=5e-2), "bf16 mismatch vs reference"

    print("KERNEL_OK")
</pallas_src>

<mosaic_0001>
module attributes {stable_mosaic.version = 11 : i64} {
  func.func @_fused_mlp_kernel(%arg0: i32, %arg1: memref<8x32xf32, #tpu.memory_space<vmem>>, %arg2: memref<32x128xf32, #tpu.memory_space<vmem>>, %arg3: memref<2x128x128xf32, #tpu.memory_space<vmem>>, %arg4: memref<1x128xf32, #tpu.memory_space<vmem>>, %arg5: memref<8x1xf32, #tpu.memory_space<vmem>>) attributes {dimension_semantics = [#tpu.dimension_semantics<parallel>], iteration_bounds = array<i64: 1>, scalar_prefetch = 0 : i64, scratch_operands = 0 : i64, tpu.core_type = #tpu.core_type<tc>, window_params = [{transform_indices = @transform_0, window_bounds = array<i64: 8, 32>}, {pipeline_mode = #tpu.pipeline_mode<synchronous>, transform_indices = @transform_1, window_bounds = array<i64: 32, 128>}, {pipeline_mode = #tpu.pipeline_mode<synchronous>, transform_indices = @transform_2, window_bounds = array<i64: 2, 128, 128>}, {pipeline_mode = #tpu.pipeline_mode<synchronous>, transform_indices = @transform_3, window_bounds = array<i64: 1, 128>}, {transform_indices = @transform_4, window_bounds = array<i64: 8, 1>}]} {
    %c0 = arith.constant 0 : index
    %c0_0 = arith.constant 0 : index
    %0 = vector.load %arg1[%c0, %c0_0] : memref<8x32xf32, #tpu.memory_space<vmem>>, vector<8x32xf32>
    %c0_1 = arith.constant 0 : index
    %c0_2 = arith.constant 0 : index
    %1 = vector.load %arg2[%c0_1, %c0_2] : memref<32x128xf32, #tpu.memory_space<vmem>>, vector<32x128xf32>
    %cst = arith.constant dense<0.000000e+00> : vector<8x128xf32>
    %2 = tpu.matmul %0, %1, %cst {dimension_numbers = #tpu.dot_dimension_numbers<[1], [0], [0], [1], [0, 0, 1, 1], [], []>} : vector<8x32xf32>, vector<32x128xf32>, vector<8x128xf32> -> vector<8x128xf32>
    %cst_3 = arith.constant 0.000000e+00 : f32
    %3 = vector.broadcast %cst_3 : f32 to vector<8x128xf32>
    %4 = arith.maximumf %2, %3 : vector<8x128xf32>
    %c0_4 = arith.constant 0 : index
    %c0_5 = arith.constant 0 : index
    %c0_6 = arith.constant 0 : index
    %5 = vector.load %arg3[%c0_4, %c0_5, %c0_6] : memref<2x128x128xf32, #tpu.memory_space<vmem>>, vector<1x128x128xf32>
    %6 = vector.shape_cast %5 : vector<1x128x128xf32> to vector<128x128xf32>
    %cst_7 = arith.constant dense<0.000000e+00> : vector<8x128xf32>
    %7 = tpu.matmul %4, %6, %cst_7 {dimension_numbers = #tpu.dot_dimension_numbers<[1], [0], [0], [1], [0, 0, 1, 1], [], []>} : vector<8x128xf32>, vector<128x128xf32>, vector<8x128xf32> -> vector<8x128xf32>
    %cst_8 = arith.constant 0.000000e+00 : f32
    %8 = vector.broadcast %cst_8 : f32 to vector<8x128xf32>
    %9 = arith.maximumf %7, %8 : vector<8x128xf32>
    %c1 = arith.constant 1 : index
    %c0_9 = arith.constant 0 : index
    %c0_10 = arith.constant 0 : index
    %10 = vector.load %arg3[%c1, %c0_9, %c0_10] : memref<2x128x128xf32, #tpu.memory_space<vmem>>, vector<1x128x128xf32>
    %11 = vector.shape_cast %10 : vector<1x128x128xf32> to vector<128x128xf32>
    %cst_11 = arith.constant dense<0.000000e+00> : vector<8x128xf32>
    %12 = tpu.matmul %9, %11, %cst_11 {dimension_numbers = #tpu.dot_dimension_numbers<[1], [0], [0], [1], [0, 0, 1, 1], [], []>} : vector<8x128xf32>, vector<128x128xf32>, vector<8x128xf32> -> vector<8x128xf32>
    %cst_12 = arith.constant 0.000000e+00 : f32
    %13 = vector.broadcast %cst_12 : f32 to vector<8x128xf32>
    %14 = arith.maximumf %12, %13 : vector<8x128xf32>
    %c0_13 = arith.constant 0 : index
    %c0_14 = arith.constant 0 : index
    %15 = vector.load %arg4[%c0_13, %c0_14] : memref<1x128xf32, #tpu.memory_space<vmem>>, vector<1x128xf32>
    %16 = vector.broadcast %15 : vector<1x128xf32> to vector<8x128xf32>
    %17 = arith.mulf %14, %16 : vector<8x128xf32>
    %cst_15 = arith.constant dense<0.000000e+00> : vector<8xf32>
    %18 = vector.multi_reduction <add>, %17, %cst_15 [1] : vector<8x128xf32> to vector<8xf32>
    %19 = vector.shape_cast %18 : vector<8xf32> to vector<8x1xf32>
    %c0_16 = arith.constant 0 : index
    %c0_17 = arith.constant 0 : index
    %20 = vector.load %arg5[%c0_16, %c0_17] : memref<8x1xf32, #tpu.memory_space<vmem>>, vector<8x1xf32>
    tpu.vector_store %arg5[%c0_16, %c0_17], %19 {strides = array<i32>} : memref<8x1xf32, #tpu.memory_space<vmem>>, vector<8x1xf32>,
    return
  }
  func.func @transform_0(%arg0: i32) -> (i32, i32) {
    %c0_i32 = arith.constant 0 : i32
    %c0_i32_0 = arith.constant 0 : i32
    return %arg0, %c0_i32 : i32, i32
  }
  func.func @transform_1(%arg0: i32) -> (i32, i32) {
    %c0_i32 = arith.constant 0 : i32
    %c0_i32_0 = arith.constant 0 : i32
    %c0_i32_1 = arith.constant 0 : i32
    return %c0_i32, %c0_i32_0 : i32, i32
  }
  func.func @transform_2(%arg0: i32) -> (i32, i32, i32) {
    %c0_i32 = arith.constant 0 : i32
    %c0_i32_0 = arith.constant 0 : i32
    %c0_i32_1 = arith.constant 0 : i32
    %c0_i32_2 = arith.constant 0 : i32
    return %c0_i32, %c0_i32_0, %c0_i32_1 : i32, i32, i32
  }
  func.func @transform_3(%arg0: i32) -> (i32, i32) {
    %c0_i32 = arith.constant 0 : i32
    %c0_i32_0 = arith.constant 0 : i32
    %c0_i32_1 = arith.constant 0 : i32
    return %c0_i32, %c0_i32_0 : i32, i32
  }
  func.func @transform_4(%arg0: i32) -> (i32, i32) {
    %c0_i32 = arith.constant 0 : i32
    %c0_i32_0 = arith.constant 0 : i32
    return %arg0, %c0_i32 : i32, i32
  }
}

</mosaic_0001>

<bundles_post_ra>
// kernel: tpu_custom_call.1
= control target key start
LH: loop header
LB: loop body
LE: loop exit
PB: predicated region body
PF: predicated region fallthrough
CT: control target
= control target key end

     0   :  { %9 = vsyncpa [#allocation3], 0  ;;  %s685_s0 = inlined_call_operand.hbm [shape: f32[8,32], index: 0, kind: input, shape index: {}]   ;;  %s686_s1 = inlined_call_operand.hbm [shape: f32[32,128], index: 1, kind: input, shape index: {}]   ;;  %s687_s2 = inlined_call_operand.hbm [shape: f32[2,128,128], index: 2, kind: input, shape index: {}]   ;;  %s688_s3 = inlined_call_operand.vmem [shape: f32[1,128], index: 3, kind: input, shape index: {}]   ;;  %s689_s4 = inlined_call_operand.vmem [shape: f32[8,1], index: 4, kind: output, shape index: {}]  }
   0x1   :  { %10 = vsyncpa [#allocation5], 0  ;;  %s583_s15 = smov [#allocation4]   ;;  %s513_s19 = scalar_lea.hbm %s686_s1, 512 }
   0x2   :  { %s26_s16 = sshll.u32 %s583_s15, 4  ;;  %p514_p0 = scmp.ne.s32.totalorder %s686_s1, %s513_s19  ;;  %s27_s16 = int_to_ptr.vmem [resolvable:$true] %s26_s16 }
   0x3   :  { %p517_p1 = scmp.lt.u32.totalorder %s513_s19, %s686_s1 }
   0x5   :  { %p519_p2 = pnand %p517_p1, %p514_p0 }
   0x7   :  { %522 = shalt.err (!%p519_p2)
}
   0x8   :  { %s523_s24 = scalar_lea.vmem %s27_s16, 512  ;;  %p528_p4 = scmp.lt.s32.totalorder %s27_s16, %s27_s16 }
   0x9   :  { %p524_p3 = scmp.ne.s32.totalorder %s27_s16, %s523_s24  ;;  %p529_p5 = scmp.lt.s32.totalorder %s523_s24, %s523_s24 }
   0xb   :  { %p530_p6 = por %p529_p5, %p528_p4 }
   0xd   :  { %p531_p7 = pnand %p530_p6, %p524_p3 }
   0xf   :  { %534 = shalt.err (!%p531_p7)
}
  0x10   :  { %s584_s25 = smov 128   ;;  %s585_s26 = smov 8  }
  0x11   :  { %32 = dma.hbm_to_vmem [thread:$0]  %s686_s1, 512, %s27_s16, [#allocation5], %s584_s25, %s584_s25, %s585_s26  }
  0x12   :  { %s586_s29 = smov [#allocation2]   ;;  %s587_s5 = smov [#allocation6]  }
  0x13   :  { %s17_s30 = sshll.u32 %s586_s29, 4  ;;  %s38_s6 = sshll.u32 %s587_s5, 4  ;;  %s18_s30 = int_to_ptr.vmem [resolvable:$true] %s17_s30  ;;  %s39_s6 = int_to_ptr.vmem [resolvable:$true] %s38_s6 }
  0x14   :  { %s535_s9 = scalar_lea.hbm %s685_s0, 128 }
  0x15   :  { %p536_p8 = scmp.ne.s32.totalorder %s685_s0, %s535_s9  ;;  %p539_p9 = scmp.lt.u32.totalorder %s535_s9, %s685_s0 }
  0x17   :  { %p541_p10 = pnand %p539_p9, %p536_p8 }
  0x19   :  { %544 = shalt.err (!%p541_p10)
}
  0x1a   :  { %s545_s1 = scalar_lea.vmem %s18_s30, 128  ;;  %p550_p12 = scmp.lt.s32.totalorder %s18_s30, %s18_s30 }
  0x1b   :  { %p546_p11 = scmp.ne.s32.totalorder %s18_s30, %s545_s1  ;;  %p551_p13 = scmp.lt.s32.totalorder %s545_s1, %s545_s1 }
  0x1d   :  { %p552_p0 = por %p551_p13, %p550_p12 }
  0x1f   :  { %p553_p1 = pnand %p552_p0, %p546_p11 }
  0x21   :  { %556 = shalt.err (!%p553_p1)
}
  0x22   :  { %20 = dma.hbm_to_vmem [thread:$0]  %s685_s0, 128, %s18_s30, [#allocation3]  }
  0x23   :  { %s557_s18 = scalar_lea.hbm %s687_s2, 4096 }
  0x24   :  { %p558_p2 = scmp.ne.s32.totalorder %s687_s2, %s557_s18  ;;  %p561_p3 = scmp.lt.u32.totalorder %s557_s18, %s687_s2 }
  0x26   :  { %p563_p4 = pnand %p561_p3, %p558_p2 }
  0x28   :  { %566 = shalt.err (!%p563_p4)
}
  0x29   :  { %s567_s23 = scalar_lea.vmem %s39_s6, 4096  ;;  %p572_p6 = scmp.lt.s32.totalorder %s39_s6, %s39_s6 }
  0x2a   :  { %p568_p5 = scmp.ne.s32.totalorder %s39_s6, %s567_s23  ;;  %p573_p7 = scmp.lt.s32.totalorder %s567_s23, %s567_s23 }
  0x2c   :  { %p574_p8 = por %p573_p7, %p572_p6 }
  0x2e   :  { %p575_p9 = pnand %p574_p8, %p568_p5 }
  0x30   :  { %578 = shalt.err (!%p575_p9)
}
  0x31   :  { %44 = dma.hbm_to_vmem [thread:$0]  %s687_s2, 4096, %s39_s6, [#allocation5], %s584_s25, %s584_s25, %s585_s26  }
  0x32   :  { %579 = dma.done.wait [#allocation3], 128  }
  0x33   :  { %580 = vsyncadd [#allocation3], 4294967168 }
  0x34   :  { %581 = dma.done.wait [#allocation5], 4608  }
  0x35   :  { %582 = vsyncadd [#allocation5], 4294962688  ;;  %v588_v0 = vmov 0.0|0.0   ;;  %vm589_vm0 = vmmov 0   ;;  %v590_v1 = vmov 0.0   ;;  %v57_v2 = vld [vmem:[#allocation4] sm:$0xff] }
  0x36   :  { %451 = vmatprep.subr.bf16.mxu0 %v588_v0  ;;  %378 = vmatprep.mubr.msk.f32.mxu0 %vm589_vm0, %v590_v1  ;;  %v58_v3 = vld [vmem:[#allocation4 + $0x8] sm:$0xff]  ;;  %v59_v4 = vld [vmem:[#allocation4 + $0x10] sm:$0xff]  ;;  %v60_v6 = vld [vmem:[#allocation4 + $0x18] sm:$0xff]  ;;  %vm61_vm1 = vcmask 261120   ;;  %vm321_vm2 = vcmask 7168  }
  0x37   :  { %457 = vmatprep.subr.bf16.mxu1 %v588_v0  ;;  %413 = vmatprep.mubr.msk.f32.mxu1 %vm589_vm0, %v590_v1  ;;  %v452_v5 = vpack.c.bf16 %v58_v3, %v57_v2  ;;  %v136_v7 = vld [vmem:[#allocation6] sm:$0xff]  ;;  %v137_v8 = vld [vmem:[#allocation6 + $0x8] sm:$0xff]  ;;  %v138_v9 = vld [vmem:[#allocation6 + $0x10] sm:$0xff]  ;;  %v455_v11 = vpack.c.bf16 %v60_v6, %v59_v4 }
  0x38   :  { %v139_v10 = vld [vmem:[#allocation6 + $0x18] sm:$0xff]  ;;  %v458_v12 = vpack.c.bf16 %v137_v8, %v136_v7  ;;  %v140_v14 = vld [vmem:[#allocation6 + $0x20] sm:$0xff]  ;;  %v141_v15 = vld [vmem:[#allocation6 + $0x28] sm:$0xff] }
  0x39   :  { %453 = vmatpush3.bf16.msra.mxu0 %v452_v5  ;;  %v461_v13 = vpack.c.bf16 %v139_v10, %v138_v9  ;;  %v56_v16 = vld [vmem:[#allocation2] sm:$0xff]  ;;  %v464_v17 = vpack.c.bf16 %v141_v15, %v140_v14  ;;  %v142_v18 = vld [vmem:[#allocation6 + $0x30] sm:$0xff]  ;;  %v144_v21 = vld [vmem:[#allocation6 + $0x40] sm:$0xff] }
  0x3a   :  { %454 = vmatprep.subr.bf16.mxu0 %v588_v0  ;;  %459 = vmatpush3.bf16.msra.mxu1 %v458_v12  ;;  %v143_v19 = vld [vmem:[#allocation6 + $0x38] sm:$0xff]  ;;  %v145_v22 = vld [vmem:[#allocation6 + $0x48] sm:$0xff]  ;;  %v146_v24 = vld [vmem:[#allocation6 + $0x50] sm:$0xff] }
  0x3b   :  { %460 = vmatprep.subr.bf16.mxu1 %v588_v0  ;;  %v467_v20 = vpack.c.bf16 %v143_v19, %v142_v18  ;;  %v470_v23 = vpack.c.bf16 %v145_v22, %v144_v21  ;;  %v147_v25 = vld [vmem:[#allocation6 + $0x58] sm:$0xff]  ;;  %v148_v27 = vld [vmem:[#allocation6 + $0x60] sm:$0xff]  ;;  %v149_v28 = vld [vmem:[#allocation6 + $0x68] sm:$0xff] }
  0x3c   :  { %v473_v26 = vpack.c.bf16 %v147_v25, %v146_v24  ;;  %v476_v29 = vpack.c.bf16 %v149_v28, %v148_v27  ;;  %v150_v30 = vld [vmem:[#allocation6 + $0x70] sm:$0xff]  ;;  %v151_v31 = vld [vmem:[#allocation6 + $0x78] sm:$0xff]  ;;  %v224_v33 = vld [vmem:[#allocation6 + $0x80] sm:$0xff] }
  0x3d   :  { %456 = vmatpush3.bf16.msra.mxu0 %v455_v11  ;;  %v479_v32 = vpack.c.bf16 %v151_v31, %v150_v30  ;;  %v225_v34 = vld [vmem:[#allocation6 + $0x88] sm:$0xff]  ;;  %v226_v35 = vld [vmem:[#allocation6 + $0x90] sm:$0xff]  ;;  %v227_v37 = vld [vmem:[#allocation6 + $0x98] sm:$0xff] }
  0x3e   :  { %481 = vmatprep.subr.bf16.mxu0 %v588_v0  ;;  %462 = vmatpush3.bf16.msra.mxu1 %v461_v13  ;;  %v482_v36 = vpack.c.bf16 %v225_v34, %v224_v33  ;;  %v485_v38 = vpack.c.bf16 %v227_v37, %v226_v35  ;;  %v228_v39 = vld [vmem:[#allocation6 + $0xa0] sm:$0xff]  ;;  %v229_v40 = vld [vmem:[#allocation6 + $0xa8] sm:$0xff]  ;;  %v230_v42 = vld [vmem:[#allocation6 + $0xb0] sm:$0xff] }
  0x3f   :  { %463 = vmatprep.subr.bf16.mxu1 %v588_v0  ;;  %v488_v41 = vpack.c.bf16 %v229_v40, %v228_v39  ;;  %v231_v43 = vld [vmem:[#allocation6 + $0xb8] sm:$0xff]  ;;  %v232_v45 = vld [vmem:[#allocation6 + $0xc0] sm:$0xff]  ;;  %v233_v46 = vld [vmem:[#allocation6 + $0xc8] sm:$0xff] }
  0x40   :  { %379 = vmatmul.mubr.msk.f32.vlgmr.msra.gmra.mrb[0].mxu0 %vm61_vm1, %v56_v16  ;;  %v491_v44 = vpack.c.bf16 %v231_v43, %v230_v42  ;;  %v494_v47 = vpack.c.bf16 %v233_v46, %v232_v45  ;;  %v234_v48 = vld [vmem:[#allocation6 + $0xd0] sm:$0xff]  ;;  %v235_v49 = vld [vmem:[#allocation6 + $0xd8] sm:$0xff]  ;;  %v236_v51 = vld [vmem:[#allocation6 + $0xe0] sm:$0xff] }
  0x41   :  { %448 = vmatprep.mubr.msk.f32.mxu0 %vm589_vm0, %v590_v1  ;;  %483 = vmatpush3.bf16.msra.mxu0 %v482_v36  ;;  %v497_v50 = vpack.c.bf16 %v235_v49, %v234_v48  ;;  %v237_v52 = vld [vmem:[#allocation6 + $0xe8] sm:$0xff]  ;;  %v238_v57 = vld [vmem:[#allocation6 + $0xf0] sm:$0xff]  ;;  %v239_v58 = vld [vmem:[#allocation6 + $0xf8] sm:$0xff] }
  0x42   :  { %465 = vmatpush3.bf16.msra.mxu1 %v464_v17  ;;  %484 = vmatprep.subr.bf16.mxu0 %v588_v0  ;;  %v500_v53 = vpack.c.bf16 %v237_v52, %v236_v51  ;;  %v503_v59 = vpack.c.bf16 %v239_v58, %v238_v57  ;;  %v330_v1 = vld [vmem:[%s688_s3] ss:$0 sm:$0xff] }
  0x43   :  { %466 = vmatprep.subr.bf16.mxu1 %v588_v0 }
  0x45   :  { %486 = vmatpush3.bf16.msra.mxu0 %v485_v38 }
  0x46   :  { %468 = vmatpush3.bf16.msra.mxu1 %v467_v20  ;;  %487 = vmatprep.subr.bf16.mxu0 %v588_v0 }
  0x47   :  { %469 = vmatprep.subr.bf16.mxu1 %v588_v0 }
  0x49   :  { %489 = vmatpush3.bf16.msra.mxu0 %v488_v41 }
  0x4a   :  { %471 = vmatpush3.bf16.msra.mxu1 %v470_v23  ;;  %490 = vmatprep.subr.bf16.mxu0 %v588_v0 }
  0x4b   :  { %472 = vmatprep.subr.bf16.mxu1 %v588_v0 }
  0x4d   :  { %492 = vmatpush3.bf16.msra.mxu0 %v491_v44 }
  0x4e   :  { %474 = vmatpush3.bf16.msra.mxu1 %v473_v26  ;;  %493 = vmatprep.subr.bf16.mxu0 %v588_v0 }
  0x4f   :  { %475 = vmatprep.subr.bf16.mxu1 %v588_v0 }
  0x51   :  { %495 = vmatpush3.bf16.msra.mxu0 %v494_v47 }
  0x52   :  { %477 = vmatpush3.bf16.msra.mxu1 %v476_v29  ;;  %496 = vmatprep.subr.bf16.mxu0 %v588_v0 }
  0x53   :  { %478 = vmatprep.subr.bf16.mxu1 %v588_v0 }
  0x55   :  { %498 = vmatpush3.bf16.msra.mxu0 %v497_v50 }
  0x56   :  { %480 = vmatpush3.bf16.msra.mxu1 %v479_v32  ;;  %499 = vmatprep.subr.bf16.mxu0 %v588_v0 }
  0x59   :  { %501 = vmatpush3.bf16.msra.mxu0 %v500_v53 }
  0x5a   :  { %502 = vmatprep.subr.bf16.mxu0 %v588_v0 }
  0x5d   :  { %504 = vmatpush3.bf16.msra.mxu0 %v503_v59 }
 0x113   :  { %v131_v54 = vpop.f32.mrb[0].mxu0 }
 0x114   :  { %v135_v55 = vmax.f32 %v131_v54, 0.0  ;;  %v380_v56 = vpop.f32.mrb[1].mxu0 }
 0x116   :  { %414 = vmatmul.mubr.f32.vlgmr.msra.gmra.mrb[0].mxu1 %v135_v55 }
 0x1e9   :  { %v218_v60 = vpop.f32.mrb[0].mxu1 }
 0x1ea   :  { %v222_v61 = vmax.f32 %v218_v60, 0.0  ;;  %v415_v62 = vpop.f32.mrb[1].mxu1 }
 0x1ec   :  { %449 = vmatmul.mubr.f32.vlgmr.msra.gmra.mrb[2].mxu0 %v222_v61 }
 0x2bf   :  { %v306_v63 = vpop.f32.mrb[2].mxu0 }
 0x2c0   :  { %v310_v2 = vmax.f32 %v306_v63, 0.0  ;;  %v450_v3 = vpop.f32.mrb[3].mxu0 }
 0x2c2   :  { %v318_v0 = vmul.f32 %v330_v1, %v310_v2 }
 0x2c4   :  { %319 = vadd.xlane.f32.xlu0 %v318_v0 }
 0x351   :  { %v320_v4 = vpop.xlane.xlu0 %319 }
 0x352   :  { %322 = vst.msk [vmem:[%s689_s4] sm:$0xff] %vm321_vm2, %v320_v4 }
 0x353   :  { %327 = vsyncpa [#allocation3], 1 }
 0x354   :  { %328 = vsyncpa [#allocation5], 1 }

</bundles_post_ra>
